<compile_context>
chip_gen: v5e
topology: v5e:2x2
jax: 0.10.0
libtpu: 0.0.40
codegen_flags: <defaults>
</compile_context>

<pallas_src>
import jax
import jax.numpy as jnp
from jax.experimental import pallas as pl
from jax.experimental.pallas import tpu as pltpu


def _round_up(x, m):
    return (x + m - 1) // m * m


def _make_kernel(hidden, hpad, compute_dtype):
    """Build the kernel; a VMEM pad-scratch is only used if hidden % 128 != 0."""
    needs_pad = hidden != hpad

    def _compute(x_pad, w1_ref, b1_ref, w2_ref, b2_ref, o_ref):
        # Layer 1 on the MXU (bf16 operands, f32 accumulation).
        h = jnp.dot(x_pad, w1_ref[...], preferred_element_type=jnp.float32)
        h = jnp.maximum(h + b1_ref[...], 0.0)                       # ReLU
        # Layer 2 ([hpad] -> 1) as VPU mul + lane reduction (avoids a
        # 1-column MXU matmul); padded lanes of h and w2 are exactly zero.
        v = jnp.sum(h * w2_ref[...], axis=-1, keepdims=True) + b2_ref[0]
        o_ref[...] = v.astype(o_ref.dtype)

    if needs_pad:
        def kernel(x_ref, w1_ref, b1_ref, w2_ref, b2_ref, o_ref, xs_ref):
            tm = xs_ref.shape[0]
            # Zero the padded K lanes every step (megacore-safe: no reliance
            # on cross-iteration scratch state), then cast the native-dtype
            # x tile into the aligned bf16 scratch.
            xs_ref[:, hidden:] = jnp.zeros((tm, hpad - hidden), xs_ref.dtype)
            xs_ref[:, :hidden] = x_ref[...].astype(xs_ref.dtype)
            _compute(xs_ref[...], w1_ref, b1_ref, w2_ref, b2_ref, o_ref)
    else:
        def kernel(x_ref, w1_ref, b1_ref, w2_ref, b2_ref, o_ref):
            _compute(x_ref[...].astype(compute_dtype),
                     w1_ref, b1_ref, w2_ref, b2_ref, o_ref)

    return kernel, needs_pad


def prepare_params(w1, b1, w2, b2, *, compute_dtype=jnp.bfloat16, lane=128):
    """One-time parameter prep (hoisted out of the per-call hot path).

    Weights are stored transposed relative to torch for right-multiplication:
      w1: [H, H] (== torch W1^T), b1: [H], w2: [H, 1] (== torch W2^T), b2: [1].
    Padded rows/cols are zero so the padding is numerically exact.
    """
    hidden = int(w1.shape[0])
    hpad = _round_up(hidden, lane)
    w1_p = jnp.zeros((hpad, hpad), compute_dtype).at[:hidden, :hidden].set(
        w1.astype(compute_dtype))
    b1_p = jnp.zeros((1, hpad), jnp.float32).at[0, :hidden].set(
        b1.astype(jnp.float32))
    w2_p = jnp.zeros((1, hpad), jnp.float32).at[0, :hidden].set(
        w2.reshape(hidden).astype(jnp.float32))
    b2_p = jnp.asarray(b2, jnp.float32).reshape(1)
    return dict(hidden=hidden, hpad=hpad, compute_dtype=compute_dtype,
                w1=w1_p, b1=b1_p, w2=w2_p, b2=b2_p)


def value_network_forward(x, params, *, tile_m=2048):
    """x: [..., hidden] -> value scores with torch .squeeze() semantics."""
    hidden = params["hidden"]
    hpad = params["hpad"]
    compute_dtype = params["compute_dtype"]

    orig_shape = x.shape
    assert orig_shape[-1] == hidden, "last dim of x must equal hidden_size"
    m = 1
    for d in orig_shape[:-1]:
        m *= int(d)
    x2d = x.reshape(m, hidden)

    # Row tile: large enough to amortize the ~0.35us per-grid-step overhead,
    # capped so there are >= 2 grid steps (keeps both v7x TensorCores busy).
    # No M padding: the last tile may be partial.
    tm = min(tile_m, _round_up(m, 8))
    if m > 8 and pl.cdiv(m, tm) < 2:
        tm = _round_up(pl.cdiv(m, 2), 8)
    num_tiles = pl.cdiv(m, tm)

    kernel, needs_pad = _make_kernel(hidden, hpad, compute_dtype)
    scratch_shapes = ([pltpu.VMEM((tm, hpad), compute_dtype)]
                      if needs_pad else [])

    x_itemsize = jnp.dtype(x.dtype).itemsize
    w_itemsize = jnp.dtype(compute_dtype).itemsize

    # VMEM budget: double-buffered x tile + resident (double-buffered) W1 +
    # pad scratch + f32 intermediate h + small vectors/out.
    vmem_bytes = int(
        2 * tm * hidden * x_itemsize
        + (tm * hpad * w_itemsize if needs_pad else 0)
        + tm * hpad * 4
        + 2 * hpad * hpad * w_itemsize
        + 4 * hpad * 4
        + 2 * tm * 4)
    vmem_limit = min(max(vmem_bytes + (8 << 20), 32 << 20), 64 << 20)

    cost = pl.CostEstimate(
        flops=2 * m * hpad * hpad + 3 * m * hpad,
        transcendentals=0,
        bytes_accessed=(m * hidden * x_itemsize        # x, native dtype
                        + hpad * hpad * w_itemsize     # W1 (bf16, resident)
                        + 2 * hpad * 4 + 4             # b1, w2 row, b2
                        + m * 4),                      # output
    )

    out = pl.pallas_call(
        kernel,
        out_shape=jax.ShapeDtypeStruct((m, 1), jnp.float32),
        grid_spec=pltpu.PrefetchScalarGridSpec(
            num_scalar_prefetch=0,
            grid=(num_tiles,),
            in_specs=[
                pl.BlockSpec((tm, hidden), lambda i: (i, 0)),      # x tile (pipelined)
                pl.BlockSpec((hpad, hpad), lambda i: (0, 0)),      # W1 (VMEM-resident)
                pl.BlockSpec((1, hpad), lambda i: (0, 0)),         # b1 (resident)
                pl.BlockSpec((1, hpad), lambda i: (0, 0)),         # w2 row (resident)
                pl.BlockSpec(memory_space=pltpu.MemorySpace.SMEM),  # b2 scalar
            ],
            out_specs=pl.BlockSpec((tm, 1), lambda i: (i, 0)),
            scratch_shapes=scratch_shapes,
        ),
        compiler_params=pltpu.CompilerParams(
            dimension_semantics=("parallel",),      # megacore-shard M on v7x
            vmem_limit_bytes=vmem_limit),
        cost_estimate=cost,
    )(x2d, params["w1"], params["b1"], params["w2"], params["b2"])

    # torch `.squeeze()` semantics: drop ALL size-1 dims of [..., 1].
    # (Returned in f32, the kernel's compute/accumulation dtype.)
    return jnp.squeeze(out.reshape(orig_shape[:-1] + (1,)))


def init_params(key, hidden_size):
    """Deterministic PyTorch-Linear-style init (uniform +/- 1/sqrt(fan_in))."""
    k1, k2, k3, k4 = jax.random.split(key, 4)
    bound1 = 1.0 / jnp.sqrt(hidden_size)
    # Stored transposed relative to torch (kernel right-multiplies).
    w1 = jax.random.uniform(k1, (hidden_size, hidden_size), jnp.float32,
                            -bound1, bound1)
    b1 = jax.random.uniform(k2, (hidden_size,), jnp.float32, -bound1, bound1)
    w2 = jax.random.uniform(k3, (hidden_size, 1), jnp.float32, -bound1, bound1)
    b2 = jax.random.uniform(k4, (1,), jnp.float32, -bound1, bound1)
    return w1, b1, w2, b2


if __name__ == "__main__":
    hidden_size = 32   # small stand-in for the default 100
    N, L = 2, 8

    key = jax.random.PRNGKey(0)
    kx, kp = jax.random.split(key)
    x = jax.random.normal(kx, (N, L, hidden_size), dtype=jnp.float32)
    w1, b1, w2, b2 = init_params(kp, hidden_size)

    params = prepare_params(w1, b1, w2, b2)        # one-time weight prep
    v = value_network_forward(x, params)
    v = jax.block_until_ready(v)

    # Reference check (plain JAX, full f32) to confirm kernel semantics.
    h_ref = jnp.maximum(x.reshape(-1, hidden_size) @ w1 + b1, 0.0)
    v_ref = (h_ref @ w2 + b2).reshape(N, L)
    assert v.shape == (N, L)
    # First GEMM runs in bf16 (f32 accumulation) -> relaxed tolerance.
    assert jnp.allclose(v, v_ref, atol=3e-2, rtol=3e-2), \
        float(jnp.max(jnp.abs(v - v_ref)))

    print("KERNEL_OK")
</pallas_src>

<mosaic_0001>
module attributes {stable_mosaic.version = 11 : i64} {
  func.func @kernel(%arg0: i32, %arg1: memref<8x32xf32, #tpu.memory_space<vmem>>, %arg2: memref<128x128xbf16, #tpu.memory_space<vmem>>, %arg3: memref<1x128xf32, #tpu.memory_space<vmem>>, %arg4: memref<1x128xf32, #tpu.memory_space<vmem>>, %arg5: memref<1xf32, #tpu.memory_space<smem>>, %arg6: memref<8x1xf32, #tpu.memory_space<vmem>>, %arg7: memref<8x128xbf16, #tpu.memory_space<vmem>>) attributes {dimension_semantics = [#tpu.dimension_semantics<parallel>], iteration_bounds = array<i64: 2>, scalar_prefetch = 0 : i64, scratch_operands = 1 : i64, tpu.core_type = #tpu.core_type<tc>, window_params = [{transform_indices = @transform_0, window_bounds = array<i64: 8, 32>}, {pipeline_mode = #tpu.pipeline_mode<synchronous>, transform_indices = @transform_1, window_bounds = array<i64: 128, 128>}, {pipeline_mode = #tpu.pipeline_mode<synchronous>, transform_indices = @transform_2, window_bounds = array<i64: 1, 128>}, {pipeline_mode = #tpu.pipeline_mode<synchronous>, transform_indices = @transform_3, window_bounds = array<i64: 1, 128>}, {transform_indices = @transform_4, window_bounds = array<i64: 1>}, {transform_indices = @transform_5, window_bounds = array<i64: 8, 1>}]} {
    %cst = arith.constant 0.000000e+00 : bf16
    %0 = vector.broadcast %cst : bf16 to vector<8x96xbf16>
    %c0 = arith.constant 0 : index
    %c32 = arith.constant 32 : index
    %1 = vector.load %arg7[%c0, %c32] : memref<8x128xbf16, #tpu.memory_space<vmem>>, vector<8x96xbf16>
    tpu.vector_store %arg7[%c0, %c32], %0 {strides = array<i32>} : memref<8x128xbf16, #tpu.memory_space<vmem>>, vector<8x96xbf16>,
    %c0_0 = arith.constant 0 : index
    %c0_1 = arith.constant 0 : index
    %2 = vector.load %arg1[%c0_0, %c0_1] : memref<8x32xf32, #tpu.memory_space<vmem>>, vector<8x32xf32>
    %3 = arith.truncf %2 : vector<8x32xf32> to vector<8x32xbf16>
    %c0_2 = arith.constant 0 : index
    %c0_3 = arith.constant 0 : index
    %4 = vector.load %arg7[%c0_2, %c0_3] : memref<8x128xbf16, #tpu.memory_space<vmem>>, vector<8x32xbf16>
    tpu.vector_store %arg7[%c0_2, %c0_3], %3 {strides = array<i32>} : memref<8x128xbf16, #tpu.memory_space<vmem>>, vector<8x32xbf16>,
    %c0_4 = arith.constant 0 : index
    %c0_5 = arith.constant 0 : index
    %5 = vector.load %arg7[%c0_4, %c0_5] : memref<8x128xbf16, #tpu.memory_space<vmem>>, vector<8x128xbf16>
    %c0_6 = arith.constant 0 : index
    %c0_7 = arith.constant 0 : index
    %6 = vector.load %arg2[%c0_6, %c0_7] : memref<128x128xbf16, #tpu.memory_space<vmem>>, vector<128x128xbf16>
    %cst_8 = arith.constant dense<0.000000e+00> : vector<8x128xf32>
    %7 = tpu.matmul %5, %6, %cst_8 {dimension_numbers = #tpu.dot_dimension_numbers<[1], [0], [0], [1], [0, 0, 1, 1], [], []>} : vector<8x128xbf16>, vector<128x128xbf16>, vector<8x128xf32> -> vector<8x128xf32>
    %c0_9 = arith.constant 0 : index
    %c0_10 = arith.constant 0 : index
    %8 = vector.load %arg3[%c0_9, %c0_10] : memref<1x128xf32, #tpu.memory_space<vmem>>, vector<1x128xf32>
    %9 = vector.broadcast %8 : vector<1x128xf32> to vector<8x128xf32>
    %10 = arith.addf %7, %9 : vector<8x128xf32>
    %cst_11 = arith.constant 0.000000e+00 : f32
    %11 = vector.broadcast %cst_11 : f32 to vector<8x128xf32>
    %12 = arith.maximumf %10, %11 : vector<8x128xf32>
    %c0_12 = arith.constant 0 : index
    %c0_13 = arith.constant 0 : index
    %13 = vector.load %arg4[%c0_12, %c0_13] : memref<1x128xf32, #tpu.memory_space<vmem>>, vector<1x128xf32>
    %14 = vector.broadcast %13 : vector<1x128xf32> to vector<8x128xf32>
    %15 = arith.mulf %12, %14 : vector<8x128xf32>
    %cst_14 = arith.constant dense<0.000000e+00> : vector<8xf32>
    %16 = vector.multi_reduction <add>, %15, %cst_14 [1] : vector<8x128xf32> to vector<8xf32>
    %17 = vector.shape_cast %16 : vector<8xf32> to vector<8x1xf32>
    %c0_15 = arith.constant 0 : index
    %18 = memref.load %arg5[%c0_15] : memref<1xf32, #tpu.memory_space<smem>>
    %19 = vector.broadcast %18 : f32 to vector<8x1xf32>
    %20 = arith.addf %17, %19 : vector<8x1xf32>
    %c0_16 = arith.constant 0 : index
    %c0_17 = arith.constant 0 : index
    %21 = vector.load %arg6[%c0_16, %c0_17] : memref<8x1xf32, #tpu.memory_space<vmem>>, vector<8x1xf32>
    tpu.vector_store %arg6[%c0_16, %c0_17], %20 {strides = array<i32>} : memref<8x1xf32, #tpu.memory_space<vmem>>, vector<8x1xf32>,
    return
  }
  func.func @transform_0(%arg0: i32) -> (i32, i32) {
    %c0_i32 = arith.constant 0 : i32
    %c0_i32_0 = arith.constant 0 : i32
    return %arg0, %c0_i32 : i32, i32
  }
  func.func @transform_1(%arg0: i32) -> (i32, i32) {
    %c0_i32 = arith.constant 0 : i32
    %c0_i32_0 = arith.constant 0 : i32
    %c0_i32_1 = arith.constant 0 : i32
    return %c0_i32, %c0_i32_0 : i32, i32
  }
  func.func @transform_2(%arg0: i32) -> (i32, i32) {
    %c0_i32 = arith.constant 0 : i32
    %c0_i32_0 = arith.constant 0 : i32
    %c0_i32_1 = arith.constant 0 : i32
    return %c0_i32, %c0_i32_0 : i32, i32
  }
  func.func @transform_3(%arg0: i32) -> (i32, i32) {
    %c0_i32 = arith.constant 0 : i32
    %c0_i32_0 = arith.constant 0 : i32
    %c0_i32_1 = arith.constant 0 : i32
    return %c0_i32, %c0_i32_0 : i32, i32
  }
  func.func @transform_4(%arg0: i32) -> i32 {
    %c0_i32 = arith.constant 0 : i32
    %c0_i32_0 = arith.constant 0 : i32
    return %c0_i32 : i32
  }
  func.func @transform_5(%arg0: i32) -> (i32, i32) {
    %c0_i32 = arith.constant 0 : i32
    %c0_i32_0 = arith.constant 0 : i32
    return %arg0, %c0_i32 : i32, i32
  }
}

</mosaic_0001>

<bundles_post_ra>
// kernel: tpu_custom_call.1
= control target key start
LH: loop header
LB: loop body
LE: loop exit
PB: predicated region body
PF: predicated region fallthrough
CT: control target
= control target key end

     0   :  { %s790_s0 = inlined_call_operand.hbm [shape: f32[16,32], index: 0, kind: input, shape index: {}]   ;;  %s791_s1 = inlined_call_operand.hbm [shape: bf16[128,128], index: 1, kind: input, shape index: {}]   ;;  %s792_s2 = inlined_call_operand.vmem [shape: f32[1,128], index: 2, kind: input, shape index: {}]   ;;  %s793_s3 = inlined_call_operand.vmem [shape: f32[1,128], index: 3, kind: input, shape index: {}]   ;;  %s794_s4 = inlined_call_operand.<no memory space> [shape: f32[1], index: 4, kind: input, shape index: {}]   ;;  %s795_s5 = inlined_call_operand.vmem [shape: f32[16,1], index: 5, kind: output, shape index: {}]  }
   0x1   :  { %10 = sst [smem:[#allocation3]] %s794_s4 }
   0x2   :  { %11 = vsyncpa [#allocation5], 0 }
   0x3   :  { %13 = vsyncpa [#allocation5 + $0x1], 0 }
   0x4   :  { %14 = vsyncpa [#allocation7], 0  ;;  %s681_s20 = smov 0   ;;  %s683_s21 = smov 0  }
   0x5   :  { %s685_s22 = smov 0   ;;  %s687_s23 = smov 0  }
   0x6 LB: > { %s172_s25 = sshll.u32 %s791_s1, 4  ;;  %s703_s26 = sadd.s32 4294967295, %s642_s23   ;;  %s642_s23 = sphi %s687_s23, %s802_s23   ;;  %s638_s22 = sphi %s685_s22, %s801_s22   ;;  %s634_s21 = sphi %s683_s21, %s800_s21   ;;  %s630_s20 = sphi %s681_s20, %s799_s20   ;;  %s173_s25 = int_to_ptr.hbm [resolvable:$true] %s172_s25 }
   0x7   : > { %p438_p0 = scmp.ge.s32.totalorder %s642_s23, 1  ;;  %p41_p1 = scmp.eq.s32.totalorder %s703_s26, 0 }
   0x8   : > { %p161_p2 = scmp.lt.s32.totalorder %s642_s23, 3  ;;  %s644_s28 = smov [#allocation6]  }
   0x9   : > { %s174_s29 = sshll.u32 %s644_s28, 4  ;;  %s645_s30 = smov 64   ;;  %s175_s29 = int_to_ptr.vmem [resolvable:$true] %s174_s29 }
   0xa   : > { %p708_p3 = pnand %p438_p0, %p161_p2  ;;  %s646_s6 = smov 4  }
   0xb   : > { %s717_s7 = sadd.s32 1, %s642_s23   ;;  %s27_s9 = sadd.s32 1, %s638_s22 }
   0xc   : > { %p495_p4 = pneg %p708_p3  ;;  %s24_s8 = ssub.s32 %s642_s23, %s717_s7 }
   0xd   : > { %p25_p6 = scmp.eq.s32.totalorder %s24_s8, 0  ;;  %p34_p7 = scmp.ne.s32.totalorder %s638_s22, %s634_s21 }
   0xe   : > { %p496_p5 = pnand %p495_p4, %p41_p1  ;;  %p35_p8 = scmp.eq.s32.totalorder %s642_s23, 0 }
   0xf   : > { %p40_p9 = scmp.ne.s32.totalorder %s634_s21, %s630_s20  ;;  %p504_p12 = scmp.lt.s32.totalorder %s642_s23, 2 }
  0x10   : > { %498 = dma.hbm_to_vmem [thread:$0]  (!%p496_p5), %s173_s25, 1024, %s175_s29, [#allocation7], %s645_s30, %s645_s30, %s646_s6  }
  0x11   : > { %s727_s10 = scalar_select %p25_p6, %s638_s22, %s27_s9  }
  0x12   : > { %p36_p10 = por %p35_p8, %p34_p7  ;;  %p731_p11 = por %p41_p1, %p40_p9 }
  0x13   : > { %s197_s12 = sand.u32 1, %s638_s22   ;;  %s442_s14 = sshll.u32 %s642_s23, 3 }
  0x14   : > { %s441_s13 = sshll.u32 %s197_s12, 3  ;;  %s205_s17 = scalar_lea.hbm %s790_s0, %s442_s14 }
  0x15   : > { %s201_s18 = scalar_lea.vmem [#allocation4], %s441_s13  ;;  %s207_s4 = sshll.u32 %s205_s17, 4  ;;  %s208_s4 = int_to_ptr.hbm [resolvable:$true] %s207_s4 }
  0x16   : > { %s209_s19 = sshll.u32 %s201_s18, 4  ;;  %p741_p13 = pnand %p504_p12, %p36_p10  ;;  %s210_s19 = int_to_ptr.vmem [resolvable:$true] %s209_s19 }
  0x17   : > { %s198_s24 = scalar_lea.sflag [#allocation5], %s197_s12  ;;  %s574_s25 = sshra.s32 %s208_s4, 4  ;;  %s575_s25 = int_to_ptr.hbm [resolvable:$true] %s574_s25 }
  0x18   : > { %s576_s28 = scalar_lea.hbm %s575_s25, 8  ;;  %p578_p2 = pneg %p741_p13 }
  0x19   : > { %p577_p0 = scmp.ne.s32.totalorder %s575_s25, %s576_s28  ;;  %s581_s30 = scalar_lea.hbm %s790_s0, 16 }
  0x1a   : > { %p582_p6 = scmp.lt.s32.totalorder %s575_s25, %s790_s0  ;;  %p583_p7 = scmp.lt.s32.totalorder %s581_s30, %s576_s28 }
  0x1b   : > { %p579_p4 = pnand %p578_p2, %p577_p0 }
  0x1c   : > { %p584_p8 = por %p583_p7, %p582_p6 }
  0x1d   : > { %p580_p5 = pneg %p579_p4 }
  0x1f   : > { %p585_p9 = pnand %p584_p8, %p580_p5 }
  0x21   : > { %588 = shalt.err (!%p585_p9)
}
  0x22   : > { %502 = dma.hbm_to_vmem [thread:$0]  (!%p741_p13), %s208_s4, 128, %s210_s19, %s198_s24  }
  0x23   : > { %218 = sbr.rel (%p708_p3) target bundleno = 326 (0x146), region = 40  ;;  %s220_s9 = sand.u32 (!%p708_p3), 1, %s634_s21  }
  0x24   : > { %s444_s12 = sshll.u32 (!%p708_p3), %s220_s9, 3  ;;  %s221_s13 = scalar_lea.sflag (!%p708_p3), [#allocation5], %s220_s9 }
  0x25   : > { %s224_s14 = scalar_lea.vmem (!%p708_p3), [#allocation4], %s444_s12 }
  0x28   : > { %621 = dma.done.wait (%p731_p11), %s221_s13, 128  }
  0x29   : > { %623 = vsyncadd (%p731_p11), %s221_s13, 4294967168 }
  0x2a   : > { %625 = dma.done.wait (%p41_p1), [#allocation7], 1024  }
  0x2b   : > { %627 = vsyncadd (%p41_p1), [#allocation7], 4294966272  ;;  %vm261_vm0 = vcmask 1043712   ;;  %v647_v0 = vmov 0   ;;  %v488_v1 = vld [vmem:[#allocation6 + $0x38] sm:$0xff]  ;;  %v487_v2 = vld [vmem:[#allocation6 + $0x30] sm:$0xff] }
  0x2c   : > { %262 = vst.msk [vmem:[#allocation2] sm:$0xf] %vm261_vm0, %v647_v0  ;;  %336 = vmatpush.bf16.msra.mxu0 %v488_v1  ;;  %v263_v3 = vld [vmem:[%s224_s14] sm:$0xff]  ;;  %vm265_vm1 = vcmask 257024   ;;  %v486_v5 = vld [vmem:[#allocation6 + $0x28] sm:$0xff]  ;;  %v485_v6 = vld [vmem:[#allocation6 + $0x20] sm:$0xff] }
  0x2d   : > { %v264_v4 = vpack.c.bf16 %v263_v3, %v263_v3  ;;  %v484_v7 = vld [vmem:[#allocation6 + $0x18] sm:$0xff]  ;;  %v483_v8 = vld [vmem:[#allocation6 + $0x10] sm:$0xff]  ;;  %v482_v9 = vld [vmem:[#allocation6 + $0x8] sm:$0xff]  ;;  %p256_p1 = scmp.lt.s32.totalorder %s703_s26, 1  ;;  %s357_s17 = sld [smem:[#allocation3]]  ;;  %vm360_vm2 = vcmask 7168  }
  0x2e   : > { %v481_v10 = vld [vmem:[#allocation6] sm:$0xff]  ;;  %v542_v12 = vld [vmem:[%s792_s2] ss:$0 sm:$0xff] }
  0x2f   : > { %266 = vst.msk [vmem:[#allocation2] sm:$0xf] %vm265_vm1, %v264_v4  ;;  %v543_v15 = vld [vmem:[%s793_s3] ss:$0 sm:$0xff]  ;;  %s804_s26 = smov (!%p256_p1, %s703_s26), 1 }
  0x30   : > { %337 = vmatpush.bf16.msra.mxu0 %v487_v2  ;;  %s446_s18 = sshll.u32 %s804_s26, 3 }
  0x31   : > { %s259_s20 = scalar_lea.vmem %s795_s5, %s446_s18 }
  0x33   : > { %v358_v19 = vstv %s357_s17 }
  0x34   : > { %338 = vmatpush.bf16.msra.mxu0 %v486_v5 }
  0x36   : > { %v267_v11 = vld [vmem:[#allocation2] sm:$0xf] }
  0x38   : > { %339 = vmatpush.bf16.msra.mxu0 %v485_v6 }
  0x3c   : > { %340 = vmatpush.bf16.msra.mxu0 %v484_v7 }
  0x40   : > { %341 = vmatpush.bf16.msra.mxu0 %v483_v8 }
  0x44   : > { %342 = vmatpush.bf16.msra.mxu0 %v482_v9 }
  0x48   : > { %343 = vmatpush.bf16.msra.mxu0 %v481_v10 }
  0x4b   : > { %344 = vmatmul.bf16.vlgmr.msra.gmra.mxu0 %v267_v11 }
  0xc8   : > { %v345_v13 = vpop.f32.mrf.mxu0 }
  0xc9   : > { %v346_v14 = vadd.f32 %v542_v12, %v345_v13 }
  0xcb   : > { %v349_v16 = vmax.f32 %v346_v14, 0.0 }
  0xcd   : > { %v354_v17 = vmul.f32 %v543_v15, %v349_v16 }
  0xcf   : > { %355 = vadd.xlane.f32.xlu0 %v354_v17 }
  0xd0   : > { %v347_v18 = vpop.f32.mrf.mxu0 }
 0x142   : > { %v356_v20 = vpop.xlane.xlu0 %355 }
 0x143   : > { %v359_v21 = vadd.f32 %v358_v19, %v356_v20 }
 0x145   : > { %361 = vst.msk [vmem:[%s259_s20] sm:$0xff] %vm360_vm2, %v359_v21 }
 0x146 PF: > { %p17_p3 = scmp.ge.s32.totalorder %s717_s7, 4   ;;  %s799_s20 = smov %s634_s21 }
 0x147   : > { %s800_s21 = smov %s638_s22  ;;  %s801_s22 = smov %s727_s10 }
 0x148   : > { %s802_s23 = smov %s717_s7  ;;  %19 = sbr.rel (!%p17_p3) target bundleno = 6 (0x6), region = 84 }
 0x14d   :  { %381 = vsyncpa [#allocation5], 1 }
 0x14e   :  { %383 = vsyncpa [#allocation5 + $0x1], 1 }
 0x14f   :  { %384 = vsyncpa [#allocation7], 1 }

</bundles_post_ra>
